<compile_context>
chip_gen: v7x
topology: tpu7x:2x2x1
jax: 0.10.0
libtpu: 0.0.40
codegen_flags: <defaults>
</compile_context>

<pallas_src>
import functools

import jax
import jax.numpy as jnp
from jax.experimental import pallas as pl
from jax.experimental.pallas import tpu as pltpu

HIDDEN1 = 128
HIDDEN2 = 64
_H2_PAD = 128  # lane-dense width for the 64-wide hidden layer


def _round_up(x, m):
    return ((x + m - 1) // m) * m


def _mlp_kernel(x_ref, w1_ref, b1_ref, w2_ref, b2_ref, w3_ref, b3_ref, ot_ref):
    """One batch tile: x (TB, in) f32 -> out^T (OUT_SUB, TB) f32."""
    # Stream x as f32 from HBM; cast to bf16 on the VPU (free, VPU has slack).
    x = x_ref[...].astype(jnp.bfloat16)

    h1 = jnp.dot(x, w1_ref[...], preferred_element_type=jnp.float32) + b1_ref[...]
    h1 = jnp.maximum(h1, 0.0)

    h2 = jnp.dot(h1.astype(jnp.bfloat16), w2_ref[...],
                 preferred_element_type=jnp.float32) + b2_ref[...]
    h2 = jnp.maximum(h2, 0.0)

    out = jnp.dot(h2.astype(jnp.bfloat16), w3_ref[...],
                  preferred_element_type=jnp.float32) + b3_ref[...]

    # Transpose the lane-dense (TB, OUT_PAD) f32 result so batch becomes the
    # lane axis (XLU work, free in this mem-bound kernel) and store only the
    # real (rounded-to-8) output sublanes -> lane-dense, minimal HBM writeback.
    out_t = out.T
    ot_ref[...] = out_t[: ot_ref.shape[0], :].astype(ot_ref.dtype)


def prepare_params(params):
    """One-time prep (hoisted out of the forward path): bf16 weights, zero-pad
    hidden2 / output widths to lane-dense multiples of 128."""
    out_size = params["w3"].shape[1]
    out_pad = _round_up(out_size, 128)

    w1 = params["w1"].astype(jnp.bfloat16)                               # (in, 128)
    b1 = params["b1"].reshape(1, HIDDEN1).astype(jnp.float32)            # (1, 128)

    w2 = jnp.zeros((HIDDEN1, _H2_PAD), jnp.bfloat16).at[:, :HIDDEN2].set(
        params["w2"].astype(jnp.bfloat16))
    b2 = jnp.zeros((1, _H2_PAD), jnp.float32).at[:, :HIDDEN2].set(
        params["b2"].reshape(1, HIDDEN2).astype(jnp.float32))

    w3 = jnp.zeros((_H2_PAD, out_pad), jnp.bfloat16).at[:HIDDEN2, :out_size].set(
        params["w3"].astype(jnp.bfloat16))
    b3 = jnp.zeros((1, out_pad), jnp.float32).at[:, :out_size].set(
        params["b3"].reshape(1, out_size).astype(jnp.float32))

    return (w1, b1, w2, b2, w3, b3), out_size


@functools.partial(jax.jit, static_argnames=("out_size", "batch_tile"))
def simpleagent_forward(x, prepared, *, out_size, batch_tile=4096):
    """x: (B, input_size) float32. prepared: output of prepare_params."""
    w1, b1, w2, b2, w3, b3 = prepared
    B, in_size = x.shape
    out_pad = w3.shape[1]
    out_sub = _round_up(out_size, 8)

    # Batch tile: full batch when it fits (block == full dim is always legal);
    # otherwise a multiple-of-128 tile with a ragged last block (Pallas pads
    # input edge blocks and only writes the valid region of output blocks).
    batch_tile = max(128, (batch_tile // 128) * 128)
    TB = B if B <= batch_tile else batch_tile
    grid = pl.cdiv(B, TB)

    # VMEM budget: resident weights + double-buffered x / out^T tiles + live
    # intermediates, with headroom; cap at 64 MiB so the request is valid on v7x.
    resident = ((in_size * HIDDEN1 + HIDDEN1 * _H2_PAD + _H2_PAD * out_pad) * 2
                + (HIDDEN1 + _H2_PAD + out_pad) * 4)
    streamed = 2 * (TB * in_size * 4 + out_sub * TB * 4)
    live = TB * (HIDDEN1 + _H2_PAD + 2 * out_pad) * 4
    vmem_limit = min(resident + streamed + live + (8 << 20), 64 << 20)

    const = lambda shape: pl.BlockSpec(shape, lambda i: (0, 0))

    out_t = pl.pallas_call(
        _mlp_kernel,
        out_shape=jax.ShapeDtypeStruct((out_sub, B), jnp.float32),
        grid_spec=pltpu.PrefetchScalarGridSpec(
            num_scalar_prefetch=0,
            grid=(grid,),
            in_specs=[
                pl.BlockSpec((TB, in_size), lambda i: (i, 0)),    # x: batch-tiled f32
                const((in_size, HIDDEN1)), const((1, HIDDEN1)),   # fc1 (VMEM-resident)
                const((HIDDEN1, _H2_PAD)), const((1, _H2_PAD)),   # fc2 (VMEM-resident)
                const((_H2_PAD, out_pad)), const((1, out_pad)),   # fc3 (VMEM-resident)
            ],
            out_specs=pl.BlockSpec((out_sub, TB), lambda i: (0, i)),  # transposed out
        ),
        compiler_params=pltpu.CompilerParams(
            dimension_semantics=("parallel",),
            vmem_limit_bytes=vmem_limit,
        ),
    )(x, w1, b1, w2, b2, w3, b3)

    # Kernel output is (out_sub, B); slice the real columns and put batch first.
    return out_t[:out_size, :].T


def init_params(key, input_size, output_size):
    """nn.Linear-style init (uniform +/- 1/sqrt(fan_in)); weights stored as
    (in_features, out_features) so the kernel computes x @ W == PyTorch x @ W.T."""
    def linear(key, fan_in, fan_out):
        kw, kb = jax.random.split(key)
        bound = 1.0 / jnp.sqrt(jnp.float32(fan_in))
        w = jax.random.uniform(kw, (fan_in, fan_out), jnp.float32, -bound, bound)
        b = jax.random.uniform(kb, (1, fan_out), jnp.float32, -bound, bound)
        return w, b

    k1, k2, k3 = jax.random.split(key, 3)
    w1, b1 = linear(k1, input_size, HIDDEN1)
    w2, b2 = linear(k2, HIDDEN1, HIDDEN2)
    w3, b3 = linear(k3, HIDDEN2, output_size)
    return {"w1": w1, "b1": b1, "w2": w2, "b2": b2, "w3": w3, "b3": b3}


def reference_forward_f32(x, p):
    h1 = jnp.maximum(x @ p["w1"] + p["b1"], 0.0)
    h2 = jnp.maximum(h1 @ p["w2"] + p["b2"], 0.0)
    return h2 @ p["w3"] + p["b3"]


def reference_forward_bf16(x, p):
    # Mirrors the kernel's precision recipe (bf16 operands, f32 accumulation).
    dot = lambda a, b: jnp.dot(a.astype(jnp.bfloat16), b.astype(jnp.bfloat16),
                               preferred_element_type=jnp.float32)
    h1 = jnp.maximum(dot(x, p["w1"]) + p["b1"], 0.0)
    h2 = jnp.maximum(dot(h1, p["w2"]) + p["b2"], 0.0)
    return dot(h2, p["w3"]) + p["b3"]


if __name__ == "__main__":
    key = jax.random.PRNGKey(0)
    k_params, k_x = jax.random.split(key)

    batch = 8
    input_size = 32
    output_size = 8

    params = init_params(k_params, input_size, output_size)
    prepared, out_size = prepare_params(params)  # one-time prep, out of forward path

    x = jax.random.normal(k_x, (batch, input_size), jnp.float32)

    out = simpleagent_forward(x, prepared, out_size=out_size)
    out = jax.block_until_ready(out)
    assert out.shape == (batch, output_size)

    # Tight check vs a reference that uses the same bf16-operand / f32-accum recipe.
    ref_bf16 = reference_forward_bf16(x, params)
    assert jnp.allclose(out, ref_bf16, atol=2e-3, rtol=2e-3), "mismatch vs bf16 reference"

    # Loose check vs the pure-f32 PyTorch-equivalent reference.
    ref_f32 = reference_forward_f32(x, params)
    assert jnp.allclose(out, ref_f32, atol=5e-2, rtol=5e-2), "mismatch vs f32 reference"

    print("KERNEL_OK")
</pallas_src>

<mosaic_0001>
module attributes {stable_mosaic.version = 11 : i64} {
  func.func @_mlp_kernel(%arg0: i32, %arg1: memref<8x32xf32, #tpu.memory_space<vmem>>, %arg2: memref<32x128xbf16, #tpu.memory_space<vmem>>, %arg3: memref<1x128xf32, #tpu.memory_space<vmem>>, %arg4: memref<128x128xbf16, #tpu.memory_space<vmem>>, %arg5: memref<1x128xf32, #tpu.memory_space<vmem>>, %arg6: memref<128x128xbf16, #tpu.memory_space<vmem>>, %arg7: memref<1x128xf32, #tpu.memory_space<vmem>>, %arg8: memref<8x8xf32, #tpu.memory_space<vmem>>) attributes {dimension_semantics = [#tpu.dimension_semantics<parallel>], iteration_bounds = array<i64: 1>, scalar_prefetch = 0 : i64, scratch_operands = 0 : i64, tpu.core_type = #tpu.core_type<tc>, window_params = [{transform_indices = @transform_0, window_bounds = array<i64: 8, 32>}, {pipeline_mode = #tpu.pipeline_mode<synchronous>, transform_indices = @transform_1, window_bounds = array<i64: 32, 128>}, {pipeline_mode = #tpu.pipeline_mode<synchronous>, transform_indices = @transform_2, window_bounds = array<i64: 1, 128>}, {pipeline_mode = #tpu.pipeline_mode<synchronous>, transform_indices = @transform_3, window_bounds = array<i64: 128, 128>}, {pipeline_mode = #tpu.pipeline_mode<synchronous>, transform_indices = @transform_4, window_bounds = array<i64: 1, 128>}, {pipeline_mode = #tpu.pipeline_mode<synchronous>, transform_indices = @transform_5, window_bounds = array<i64: 128, 128>}, {pipeline_mode = #tpu.pipeline_mode<synchronous>, transform_indices = @transform_6, window_bounds = array<i64: 1, 128>}, {transform_indices = @transform_7, window_bounds = array<i64: 8, 8>}]} {
    %c0 = arith.constant 0 : index
    %c0_0 = arith.constant 0 : index
    %0 = vector.load %arg1[%c0, %c0_0] : memref<8x32xf32, #tpu.memory_space<vmem>>, vector<8x32xf32>
    %1 = arith.truncf %0 : vector<8x32xf32> to vector<8x32xbf16>
    %c0_1 = arith.constant 0 : index
    %c0_2 = arith.constant 0 : index
    %2 = vector.load %arg2[%c0_1, %c0_2] : memref<32x128xbf16, #tpu.memory_space<vmem>>, vector<32x128xbf16>
    %cst = arith.constant dense<0.000000e+00> : vector<8x128xf32>
    %3 = tpu.matmul %1, %2, %cst {dimension_numbers = #tpu.dot_dimension_numbers<[1], [0], [0], [1], [0, 0, 1, 1], [], []>} : vector<8x32xbf16>, vector<32x128xbf16>, vector<8x128xf32> -> vector<8x128xf32>
    %c0_3 = arith.constant 0 : index
    %c0_4 = arith.constant 0 : index
    %4 = vector.load %arg3[%c0_3, %c0_4] : memref<1x128xf32, #tpu.memory_space<vmem>>, vector<1x128xf32>
    %5 = vector.broadcast %4 : vector<1x128xf32> to vector<8x128xf32>
    %6 = arith.addf %3, %5 : vector<8x128xf32>
    %cst_5 = arith.constant 0.000000e+00 : f32
    %7 = vector.broadcast %cst_5 : f32 to vector<8x128xf32>
    %8 = arith.maximumf %6, %7 : vector<8x128xf32>
    %9 = arith.truncf %8 : vector<8x128xf32> to vector<8x128xbf16>
    %c0_6 = arith.constant 0 : index
    %c0_7 = arith.constant 0 : index
    %10 = vector.load %arg4[%c0_6, %c0_7] : memref<128x128xbf16, #tpu.memory_space<vmem>>, vector<128x128xbf16>
    %cst_8 = arith.constant dense<0.000000e+00> : vector<8x128xf32>
    %11 = tpu.matmul %9, %10, %cst_8 {dimension_numbers = #tpu.dot_dimension_numbers<[1], [0], [0], [1], [0, 0, 1, 1], [], []>} : vector<8x128xbf16>, vector<128x128xbf16>, vector<8x128xf32> -> vector<8x128xf32>
    %c0_9 = arith.constant 0 : index
    %c0_10 = arith.constant 0 : index
    %12 = vector.load %arg5[%c0_9, %c0_10] : memref<1x128xf32, #tpu.memory_space<vmem>>, vector<1x128xf32>
    %13 = vector.broadcast %12 : vector<1x128xf32> to vector<8x128xf32>
    %14 = arith.addf %11, %13 : vector<8x128xf32>
    %cst_11 = arith.constant 0.000000e+00 : f32
    %15 = vector.broadcast %cst_11 : f32 to vector<8x128xf32>
    %16 = arith.maximumf %14, %15 : vector<8x128xf32>
    %17 = arith.truncf %16 : vector<8x128xf32> to vector<8x128xbf16>
    %c0_12 = arith.constant 0 : index
    %c0_13 = arith.constant 0 : index
    %18 = vector.load %arg6[%c0_12, %c0_13] : memref<128x128xbf16, #tpu.memory_space<vmem>>, vector<128x128xbf16>
    %cst_14 = arith.constant dense<0.000000e+00> : vector<8x128xf32>
    %19 = tpu.matmul %17, %18, %cst_14 {dimension_numbers = #tpu.dot_dimension_numbers<[1], [0], [0], [1], [0, 0, 1, 1], [], []>} : vector<8x128xbf16>, vector<128x128xbf16>, vector<8x128xf32> -> vector<8x128xf32>
    %c0_15 = arith.constant 0 : index
    %c0_16 = arith.constant 0 : index
    %20 = vector.load %arg7[%c0_15, %c0_16] : memref<1x128xf32, #tpu.memory_space<vmem>>, vector<1x128xf32>
    %21 = vector.broadcast %20 : vector<1x128xf32> to vector<8x128xf32>
    %22 = arith.addf %19, %21 : vector<8x128xf32>
    %23 = tpu.transpose %22, [1, 0] : vector<8x128xf32> -> vector<128x8xf32>
    %24 = vector.extract_strided_slice %23 {offsets = [0, 0], sizes = [8, 8], strides = [1, 1]} : vector<128x8xf32> to vector<8x8xf32>
    %c0_17 = arith.constant 0 : index
    %c0_18 = arith.constant 0 : index
    %25 = vector.load %arg8[%c0_17, %c0_18] : memref<8x8xf32, #tpu.memory_space<vmem>>, vector<8x8xf32>
    tpu.vector_store %arg8[%c0_17, %c0_18], %24 {strides = array<i32>} : memref<8x8xf32, #tpu.memory_space<vmem>>, vector<8x8xf32>,
    return
  }
  func.func @transform_0(%arg0: i32) -> (i32, i32) {
    %c0_i32 = arith.constant 0 : i32
    %c0_i32_0 = arith.constant 0 : i32
    return %arg0, %c0_i32 : i32, i32
  }
  func.func @transform_1(%arg0: i32) -> (i32, i32) {
    %c0_i32 = arith.constant 0 : i32
    %c0_i32_0 = arith.constant 0 : i32
    %c0_i32_1 = arith.constant 0 : i32
    return %c0_i32, %c0_i32_0 : i32, i32
  }
  func.func @transform_2(%arg0: i32) -> (i32, i32) {
    %c0_i32 = arith.constant 0 : i32
    %c0_i32_0 = arith.constant 0 : i32
    %c0_i32_1 = arith.constant 0 : i32
    return %c0_i32, %c0_i32_0 : i32, i32
  }
  func.func @transform_3(%arg0: i32) -> (i32, i32) {
    %c0_i32 = arith.constant 0 : i32
    %c0_i32_0 = arith.constant 0 : i32
    %c0_i32_1 = arith.constant 0 : i32
    return %c0_i32, %c0_i32_0 : i32, i32
  }
  func.func @transform_4(%arg0: i32) -> (i32, i32) {
    %c0_i32 = arith.constant 0 : i32
    %c0_i32_0 = arith.constant 0 : i32
    %c0_i32_1 = arith.constant 0 : i32
    return %c0_i32, %c0_i32_0 : i32, i32
  }
  func.func @transform_5(%arg0: i32) -> (i32, i32) {
    %c0_i32 = arith.constant 0 : i32
    %c0_i32_0 = arith.constant 0 : i32
    %c0_i32_1 = arith.constant 0 : i32
    return %c0_i32, %c0_i32_0 : i32, i32
  }
  func.func @transform_6(%arg0: i32) -> (i32, i32) {
    %c0_i32 = arith.constant 0 : i32
    %c0_i32_0 = arith.constant 0 : i32
    %c0_i32_1 = arith.constant 0 : i32
    return %c0_i32, %c0_i32_0 : i32, i32
  }
  func.func @transform_7(%arg0: i32) -> (i32, i32) {
    %c0_i32 = arith.constant 0 : i32
    %c0_i32_0 = arith.constant 0 : i32
    return %c0_i32, %arg0 : i32, i32
  }
}

</mosaic_0001>

<bundles_post_ra>
// kernel: simpleagent_forward.1
= control target key start
LH: loop header
LB: loop body
LE: loop exit
PB: predicated region body
PF: predicated region fallthrough
CT: control target
= control target key end

     0   :  { %12 = vsyncpa [#allocation3], 0  ;;  %s768_s0 = inlined_call_operand.hbm [shape: f32[8,32], index: 0, kind: input, shape index: {}]   ;;  %s769_s1 = inlined_call_operand.hbm [shape: bf16[32,128], index: 1, kind: input, shape index: {}]   ;;  %s770_s2 = inlined_call_operand.vmem [shape: f32[1,128], index: 2, kind: input, shape index: {}]   ;;  %s771_s3 = inlined_call_operand.hbm [shape: bf16[128,128], index: 3, kind: input, shape index: {}]   ;;  %s772_s4 = inlined_call_operand.vmem [shape: f32[1,128], index: 4, kind: input, shape index: {}]   ;;  %s773_s5 = inlined_call_operand.hbm [shape: bf16[128,128], index: 5, kind: input, shape index: {}]   ;;  %s774_s6 = inlined_call_operand.vmem [shape: f32[1,128], index: 6, kind: input, shape index: {}]   ;;  %s775_s7 = inlined_call_operand.vmem [shape: f32[8,8], index: 7, kind: output, shape index: {}]  }
   0x1   :  { %13 = vsyncpa [#allocation5], 0 }
   0x2   :  { %14 = vsyncpa [#allocation8], 0  ;;  %s627_s24 = smov [#allocation4]   ;;  %s533_s28 = scalar_lea.hbm %s769_s1, 256 }
   0x3   :  { %s30_s25 = sshll.u32 %s627_s24, 4  ;;  %p534_p0 = scmp.ne.s32.totalorder %s769_s1, %s533_s28  ;;  %s31_s25 = int_to_ptr.vmem [resolvable:$true] %s30_s25 }
   0x4   :  { %p537_p1 = scmp.lt.u32.totalorder %s533_s28, %s769_s1 }
   0x6   :  { %p539_p2 = pnand %p537_p1, %p534_p0 }
   0x8   :  { %542 = shalt.err (!%p539_p2)
}
   0x9   :  { %s543_s10 = scalar_lea.vmem %s31_s25, 256  ;;  %p548_p4 = scmp.lt.s32.totalorder %s31_s25, %s31_s25 }
   0xa   :  { %p544_p3 = scmp.ne.s32.totalorder %s31_s25, %s543_s10  ;;  %p549_p5 = scmp.lt.s32.totalorder %s543_s10, %s543_s10 }
   0xc   :  { %p550_p6 = por %p549_p5, %p548_p4 }
   0xe   :  { %p551_p7 = pnand %p550_p6, %p544_p3 }
  0x10   :  { %554 = shalt.err (!%p551_p7)
}
  0x11   :  { %s628_s11 = smov 64   ;;  %s629_s12 = smov 4  }
  0x12   :  { %36 = dma.hbm_to_vmem [thread:$0]  %s769_s1, 256, %s31_s25, [#allocation5], %s628_s11, %s628_s11, %s629_s12  }
  0x13   :  { %s630_s15 = smov [#allocation2]   ;;  %s631_s17 = smov [#allocation6]  }
  0x14   :  { %s21_s16 = sshll.u32 %s630_s15, 4  ;;  %s44_s18 = sshll.u32 %s631_s17, 4  ;;  %s22_s16 = int_to_ptr.vmem [resolvable:$true] %s21_s16  ;;  %s45_s18 = int_to_ptr.vmem [resolvable:$true] %s44_s18 }
  0x15   :  { %s555_s21 = scalar_lea.hbm %s768_s0, 128 }
  0x16   :  { %p556_p8 = scmp.ne.s32.totalorder %s768_s0, %s555_s21  ;;  %p559_p9 = scmp.lt.u32.totalorder %s555_s21, %s768_s0 }
  0x18   :  { %p561_p10 = pnand %p559_p9, %p556_p8 }
  0x1a   :  { %564 = shalt.err (!%p561_p10)
}
  0x1b   :  { %s565_s1 = scalar_lea.vmem %s22_s16, 128  ;;  %p570_p12 = scmp.lt.s32.totalorder %s22_s16, %s22_s16 }
  0x1c   :  { %p566_p11 = scmp.ne.s32.totalorder %s22_s16, %s565_s1  ;;  %p571_p13 = scmp.lt.s32.totalorder %s565_s1, %s565_s1 }
  0x1e   :  { %p572_p0 = por %p571_p13, %p570_p12 }
  0x20   :  { %p573_p1 = pnand %p572_p0, %p566_p11 }
  0x22   :  { %576 = shalt.err (!%p573_p1)
}
  0x23   :  { %24 = dma.hbm_to_vmem [thread:$0]  %s768_s0, 128, %s22_s16, [#allocation3]  }
  0x24   :  { %s577_s30 = scalar_lea.hbm %s771_s3, 1024 }
  0x25   :  { %p578_p2 = scmp.ne.s32.totalorder %s771_s3, %s577_s30  ;;  %p581_p3 = scmp.lt.u32.totalorder %s577_s30, %s771_s3 }
  0x27   :  { %p583_p4 = pnand %p581_p3, %p578_p2 }
  0x29   :  { %586 = shalt.err (!%p583_p4)
}
  0x2a   :  { %s587_s14 = scalar_lea.vmem %s45_s18, 1024  ;;  %p592_p6 = scmp.lt.s32.totalorder %s45_s18, %s45_s18 }
  0x2b   :  { %p588_p5 = scmp.ne.s32.totalorder %s45_s18, %s587_s14  ;;  %p593_p7 = scmp.lt.s32.totalorder %s587_s14, %s587_s14 }
  0x2d   :  { %p594_p8 = por %p593_p7, %p592_p6 }
  0x2f   :  { %p595_p9 = pnand %p594_p8, %p588_p5 }
  0x31   :  { %598 = shalt.err (!%p595_p9)
}
  0x32   :  { %50 = dma.hbm_to_vmem [thread:$0]  %s771_s3, 1024, %s45_s18, [#allocation5], %s628_s11, %s628_s11, %s629_s12  }
  0x33   :  { %s632_s16 = smov [#allocation7]   ;;  %s599_s21 = scalar_lea.hbm %s773_s5, 1024 }
  0x34   :  { %s58_s17 = sshll.u32 %s632_s16, 4  ;;  %p600_p10 = scmp.ne.s32.totalorder %s773_s5, %s599_s21  ;;  %s59_s17 = int_to_ptr.vmem [resolvable:$true] %s58_s17 }
  0x35   :  { %p603_p11 = scmp.lt.u32.totalorder %s599_s21, %s773_s5 }
  0x37   :  { %p605_p12 = pnand %p603_p11, %p600_p10 }
  0x39   :  { %608 = shalt.err (!%p605_p12)
}
  0x3a   :  { %s609_s1 = scalar_lea.vmem %s59_s17, 1024  ;;  %p614_p0 = scmp.lt.s32.totalorder %s59_s17, %s59_s17 }
  0x3b   :  { %p610_p13 = scmp.ne.s32.totalorder %s59_s17, %s609_s1  ;;  %p615_p1 = scmp.lt.s32.totalorder %s609_s1, %s609_s1 }
  0x3d   :  { %p616_p2 = por %p615_p1, %p614_p0 }
  0x3f   :  { %p617_p3 = pnand %p616_p2, %p610_p13 }
  0x41   :  { %620 = shalt.err (!%p617_p3)
}
  0x42   :  { %64 = dma.hbm_to_vmem [thread:$0]  %s773_s5, 1024, %s59_s17, [#allocation8], %s628_s11, %s628_s11, %s629_s12  }
  0x43   :  { %621 = dma.done.wait [#allocation3], 128  }
  0x44   :  { %622 = vsyncadd [#allocation3], 4294967168 }
  0x45   :  { %623 = dma.done.wait [#allocation5], 1280  }
  0x46   :  { %624 = vsyncadd [#allocation5], 4294966016 }
  0x47   :  { %625 = dma.done.wait [#allocation8], 1024  }
  0x48   :  { %626 = vsyncadd [#allocation8], 4294966272  ;;  %v633_v0 = vmov 0.0   ;;  %vm634_vm0 = vmmov 0   ;;  %v515_v1 = vld [vmem:[#allocation4] sm:$0xff]   ;;  %v516_v2 = vld [vmem:[#allocation4 + $0x8] sm:$0xff]  }
  0x49   :  { %459 = vmatprep.subr.bf16.mxu0 %v633_v0  ;;  %463 = vmatprep.mubr.msk.bf16.mxu0 %vm634_vm0, %v633_v0  ;;  %v80_v3 = vld [vmem:[#allocation2] sm:$0xff]  ;;  %v517_v4 = vld [vmem:[#allocation6] sm:$0xff]   ;;  %vm105_vm1 = vcmask 261120   ;;  %v519_v7 = vld [vmem:[#allocation6 + $0x10] sm:$0xff]   ;;  %vm407_vm2 = vcmask 64512  }
  0x4a   :  { %467 = vmatprep.subr.bf16.mxu1 %v633_v0  ;;  %483 = vmatprep.mubr.msk.bf16.mxu1 %vm634_vm0, %v633_v0  ;;  %v81_v5 = vpack.c.bf16 %v80_v3, %v80_v3  ;;  %v518_v6 = vld [vmem:[#allocation6 + $0x8] sm:$0xff]   ;;  %v520_v8 = vld [vmem:[#allocation6 + $0x18] sm:$0xff]   ;;  %v521_v9 = vld [vmem:[#allocation6 + $0x20] sm:$0xff]  }
  0x4b   :  { %460 = vmatpush3.bf16.msra.mxu0 %v515_v1  ;;  %468 = vmatpush3.bf16.msra.mxu1 %v517_v4  ;;  %v522_v10 = vld [vmem:[#allocation6 + $0x28] sm:$0xff]   ;;  %v523_v11 = vld [vmem:[#allocation6 + $0x30] sm:$0xff]   ;;  %v524_v12 = vld [vmem:[#allocation6 + $0x38] sm:$0xff]  }
  0x4c   :  { %461 = vmatprep.subr.bf16.mxu0 %v633_v0  ;;  %469 = vmatprep.subr.bf16.mxu1 %v633_v0  ;;  %v525_v13 = vld [vmem:[#allocation7] sm:$0xff]   ;;  %v526_v14 = vld [vmem:[#allocation7 + $0x8] sm:$0xff]   ;;  %v527_v15 = vld [vmem:[#allocation7 + $0x10] sm:$0xff]  }
  0x4d   :  { %v528_v16 = vld [vmem:[#allocation7 + $0x18] sm:$0xff]   ;;  %v529_v17 = vld [vmem:[#allocation7 + $0x20] sm:$0xff]   ;;  %v530_v18 = vld [vmem:[#allocation7 + $0x28] sm:$0xff]  }
  0x4e   :  { %v416_v19 = vld [vmem:[%s770_s2] ss:$0 sm:$0xff]  ;;  %v531_v27 = vld [vmem:[#allocation7 + $0x30] sm:$0xff]   ;;  %v532_v28 = vld [vmem:[#allocation7 + $0x38] sm:$0xff]  }
  0x4f   :  { %462 = vmatpush3.bf16.msra.mxu0 %v516_v2  ;;  %470 = vmatpush3.bf16.msra.mxu1 %v518_v6  ;;  %v420_v29 = vld [vmem:[%s772_s4] ss:$0 sm:$0xff] }
  0x50   :  { %487 = vmatprep.subr.bf16.mxu0 %v633_v0  ;;  %471 = vmatprep.subr.bf16.mxu1 %v633_v0  ;;  %v429_v37 = vld [vmem:[%s774_s6] ss:$0 sm:$0xff] }
  0x52   :  { %464 = vmatmul.mubr.msk.bf16.vlgmr.msra.gmra.mrb[0].mxu0 %vm105_vm1, %v81_v5 }
  0x53   :  { %503 = vmatprep.mubr.msk.bf16.mxu0 %vm634_vm0, %v633_v0  ;;  %472 = vmatpush3.bf16.msra.mxu1 %v519_v7 }
  0x54   :  { %473 = vmatprep.subr.bf16.mxu1 %v633_v0  ;;  %488 = vmatpush3.bf16.msra.mxu0 %v525_v13 }
  0x55   :  { %489 = vmatprep.subr.bf16.mxu0 %v633_v0 }
  0x57   :  { %474 = vmatpush3.bf16.msra.mxu1 %v520_v8 }
  0x58   :  { %475 = vmatprep.subr.bf16.mxu1 %v633_v0  ;;  %490 = vmatpush3.bf16.msra.mxu0 %v526_v14 }
  0x59   :  { %491 = vmatprep.subr.bf16.mxu0 %v633_v0 }
  0x5b   :  { %476 = vmatpush3.bf16.msra.mxu1 %v521_v9 }
  0x5c   :  { %477 = vmatprep.subr.bf16.mxu1 %v633_v0  ;;  %492 = vmatpush3.bf16.msra.mxu0 %v527_v15 }
  0x5d   :  { %493 = vmatprep.subr.bf16.mxu0 %v633_v0 }
  0x5f   :  { %478 = vmatpush3.bf16.msra.mxu1 %v522_v10 }
  0x60   :  { %479 = vmatprep.subr.bf16.mxu1 %v633_v0  ;;  %494 = vmatpush3.bf16.msra.mxu0 %v528_v16 }
  0x61   :  { %495 = vmatprep.subr.bf16.mxu0 %v633_v0 }
  0x63   :  { %480 = vmatpush3.bf16.msra.mxu1 %v523_v11 }
  0x64   :  { %481 = vmatprep.subr.bf16.mxu1 %v633_v0  ;;  %496 = vmatpush3.bf16.msra.mxu0 %v529_v17 }
  0x65   :  { %497 = vmatprep.subr.bf16.mxu0 %v633_v0 }
  0x67   :  { %482 = vmatpush3.bf16.msra.mxu1 %v524_v12 }
  0x68   :  { %498 = vmatpush3.bf16.msra.mxu0 %v530_v18 }
  0x69   :  { %499 = vmatprep.subr.bf16.mxu0 %v633_v0 }
  0x6c   :  { %500 = vmatpush3.bf16.msra.mxu0 %v531_v27 }
  0x6d   :  { %501 = vmatprep.subr.bf16.mxu0 %v633_v0 }
  0x70   :  { %502 = vmatpush3.bf16.msra.mxu0 %v532_v28 }
 0x125   :  { %v143_v20 = vpop.f32.mrb[0].mxu0 }
 0x126   :  { %v144_v21 = vadd.f32 %v416_v19, %v143_v20  ;;  %v465_v22 = vpop.f32.mrb[1].mxu0 }
 0x127   :  { %v146_v23 = vpop.f32.mrb[2].mxu0 }
 0x128   :  { %v149_v24 = vmax.f32 %v144_v21, 0.0  ;;  %v466_v25 = vpop.f32.mrb[3].mxu0 }
 0x12a   :  { %v150_v26 = vpack.c.bf16 %v149_v24, %v149_v24 }
 0x12c   :  { %484 = vmatmul.mubr.bf16.vlgmr.msra.gmra.mrb[0].mxu1 %v150_v26 }
 0x1ff   :  { %v256_v30 = vpop.f32.mrb[0].mxu1 }
 0x200   :  { %v257_v31 = vadd.f32 %v420_v29, %v256_v30  ;;  %v485_v32 = vpop.f32.mrb[1].mxu1 }
 0x201   :  { %v259_v33 = vpop.f32.mrb[2].mxu1 }
 0x202   :  { %v262_v34 = vmax.f32 %v257_v31, 0.0  ;;  %v486_v35 = vpop.f32.mrb[3].mxu1 }
 0x204   :  { %v263_v36 = vpack.c.bf16 %v262_v34, %v262_v34 }
 0x206   :  { %504 = vmatmul.mubr.bf16.vlgmr.msra.gmra.mrb[4].mxu0 %v263_v36 }
 0x2d9   :  { %v369_v38 = vpop.f32.mrb[4].mxu0 }
 0x2da   :  { %v505_v39 = vpop.f32.mrb[5].mxu0  ;;  %v370_v40 = vadd.f32 %v429_v37, %v369_v38 }
 0x2db   :  { %v372_v41 = vpop.f32.mrb[6].mxu0 }
 0x2dc   :  { %375 = vxpose.xlu0.b32.start.end [1/1] (short) (narrow) %v370_v40, 8  ;;  %v506_v42 = vpop.f32.mrb[7].mxu0 }
 0x35c   :  { %v391_v43 = vpop.trf.xlu0 }
 0x35d   :  { %408 = vst.msk [vmem:[%s775_s7] sm:$0xff] %vm407_vm2, %v391_v43 }
 0x35e   :  { %413 = vsyncpa [#allocation3], 1 }
 0x35f   :  { %414 = vsyncpa [#allocation5], 1 }
 0x360   :  { %415 = vsyncpa [#allocation8], 1 }

</bundles_post_ra>
